<compile_context>
chip_gen: v5e
topology: v5e:2x2
jax: 0.10.0
libtpu: 0.0.40
codegen_flags: <defaults>
</compile_context>

<pallas_src>
import jax
import jax.numpy as jnp
from jax.experimental import pallas as pl
from jax.experimental.pallas import tpu as pltpu

# config (consistent with the module's forward)
SEQ_LEN = 8      # config.seq_len
D_MODEL = 32     # config.d_model
N_OUT = 5        # final Linear(d_model, 5)
N_PAD = 8        # head padded only to 8 columns (sliced back to 5)
BATCH = 8        # small demo batch


def _round_up(n, m):
    return ((n + m - 1) // m) * m


def _choose_tb(batch, tb_max=4096, min_steps=4):
    """Pick the batch tile: big enough to amortize per-grid-step overhead,
    small enough to keep >= min_steps grid steps (v7x megacore) when possible."""
    tb = _round_up(max(-(-batch // min_steps), 8), 8)
    return max(8, min(tb_max, tb))


def bp_kernel(x_ref, w2_ref, b2_ref, w3_ref, b3_ref, o_ref):
    # fc2: Linear(seq_len, d_model) + ReLU
    x = x_ref[...]                                                     # (TB, seq_len)
    h = jnp.dot(x, w2_ref[...], preferred_element_type=jnp.float32)    # (TB, d_model)
    h = jnp.maximum(h + b2_ref[...], 0.0)
    # fc3: Linear(d_model, 5) -- computed into an 8-wide block; columns 5..7
    # have zero weight/bias so they come out exactly zero.
    y = jnp.dot(h, w3_ref[...], preferred_element_type=jnp.float32)    # (TB, N_PAD)
    o_ref[...] = (y + b3_ref[...]).astype(o_ref.dtype)


def bp_forward(x, w2, b2, w3_pad, b3_pad, *, tb=None):
    """x: (B, seq_len) f32 -> (B, N_OUT) f32.

    Batch is tiled with TB-row blocks (TB a multiple of 8); weights/biases are
    full blocks with a constant index_map so they stay VMEM-resident across
    grid steps.  No wrapper-side padding of the batch: the grid is cdiv(B, tb)
    and the final partial block's out-of-bounds rows are discarded by Pallas
    (the compute is strictly row-independent, so garbage OOB input rows never
    feed rows we keep).
    """
    B, S = x.shape
    if tb is None:
        tb = _choose_tb(B)

    grid = (pl.cdiv(B, tb),)
    out_padded = pl.pallas_call(
        bp_kernel,
        out_shape=jax.ShapeDtypeStruct((B, N_PAD), jnp.float32),
        grid=grid,
        in_specs=[
            pl.BlockSpec((tb, S), lambda i: (i, 0)),          # x: tiled over batch
            pl.BlockSpec(w2.shape, lambda i: (0, 0)),         # weights: resident
            pl.BlockSpec(b2.shape, lambda i: (0, 0)),
            pl.BlockSpec(w3_pad.shape, lambda i: (0, 0)),
            pl.BlockSpec(b3_pad.shape, lambda i: (0, 0)),
        ],
        out_specs=pl.BlockSpec((tb, N_PAD), lambda i: (i, 0)),
        compiler_params=pltpu.CompilerParams(
            dimension_semantics=("parallel",),                # v7x: 2 TCs split batch
        ),
    )(x, w2, b2, w3_pad, b3_pad)
    return out_padded[:, :N_OUT]


def init_params(key):
    """Deterministic init mimicking nn.Linear's U(-1/sqrt(fan_in), 1/sqrt(fan_in))."""
    k1, k2, k3, k4 = jax.random.split(key, 4)
    bound2 = 1.0 / jnp.sqrt(SEQ_LEN)
    bound3 = 1.0 / jnp.sqrt(D_MODEL)
    # weights stored transposed: (in_features, out_features)
    w2 = jax.random.uniform(k1, (SEQ_LEN, D_MODEL), jnp.float32, -bound2, bound2)
    b2 = jax.random.uniform(k2, (1, D_MODEL), jnp.float32, -bound2, bound2)
    w3 = jax.random.uniform(k3, (D_MODEL, N_OUT), jnp.float32, -bound3, bound3)
    b3 = jax.random.uniform(k4, (1, N_OUT), jnp.float32, -bound3, bound3)
    return w2, b2, w3, b3


def pad_head(w3, b3):
    """Zero-pad the final layer from 5 to 8 output columns (sliced in wrapper)."""
    w3_pad = jnp.zeros((D_MODEL, N_PAD), jnp.float32).at[:, :N_OUT].set(w3)
    b3_pad = jnp.zeros((1, N_PAD), jnp.float32).at[:, :N_OUT].set(b3)
    return w3_pad, b3_pad


def _reference(x, w2, b2, w3, b3):
    return jnp.maximum(x @ w2 + b2, 0.0) @ w3 + b3


if __name__ == "__main__":
    key = jax.random.PRNGKey(0)
    kx, kp, kbig = jax.random.split(key, 3)
    w2, b2, w3, b3 = init_params(kp)
    w3_pad, b3_pad = pad_head(w3, b3)

    # small demo batch (single grid step)
    x = jax.random.normal(kx, (BATCH, SEQ_LEN), jnp.float32)
    out = jax.block_until_ready(bp_forward(x, w2, b2, w3_pad, b3_pad))
    ref = _reference(x, w2, b2, w3, b3)
    assert out.shape == (BATCH, N_OUT)
    assert jnp.allclose(out, ref, atol=1e-5, rtol=1e-5)

    # exercise the tiled path: grid > 1, batch not a multiple of the tile,
    # final partial block handled by Pallas (no wrapper-side padding of x)
    x_big = jax.random.normal(kbig, (1000, SEQ_LEN), jnp.float32)
    out_big = jax.block_until_ready(bp_forward(x_big, w2, b2, w3_pad, b3_pad))
    ref_big = _reference(x_big, w2, b2, w3, b3)
    assert out_big.shape == (1000, N_OUT)
    assert jnp.allclose(out_big, ref_big, atol=1e-5, rtol=1e-5)

    print("KERNEL_OK")
</pallas_src>

<mosaic_0001>
module attributes {stable_mosaic.version = 11 : i64} {
  func.func @bp_kernel(%arg0: i32, %arg1: memref<8x8xf32, #tpu.memory_space<vmem>>, %arg2: memref<8x32xf32, #tpu.memory_space<vmem>>, %arg3: memref<1x32xf32, #tpu.memory_space<vmem>>, %arg4: memref<32x8xf32, #tpu.memory_space<vmem>>, %arg5: memref<1x8xf32, #tpu.memory_space<vmem>>, %arg6: memref<8x8xf32, #tpu.memory_space<vmem>>) attributes {dimension_semantics = [#tpu.dimension_semantics<parallel>], iteration_bounds = array<i64: 1>, scalar_prefetch = 0 : i64, scratch_operands = 0 : i64, tpu.core_type = #tpu.core_type<tc>, window_params = [{transform_indices = @transform_0, window_bounds = array<i64: 8, 8>}, {pipeline_mode = #tpu.pipeline_mode<synchronous>, transform_indices = @transform_1, window_bounds = array<i64: 8, 32>}, {pipeline_mode = #tpu.pipeline_mode<synchronous>, transform_indices = @transform_2, window_bounds = array<i64: 1, 32>}, {pipeline_mode = #tpu.pipeline_mode<synchronous>, transform_indices = @transform_3, window_bounds = array<i64: 32, 8>}, {pipeline_mode = #tpu.pipeline_mode<synchronous>, transform_indices = @transform_4, window_bounds = array<i64: 1, 8>}, {transform_indices = @transform_5, window_bounds = array<i64: 8, 8>}]} {
    %c0 = arith.constant 0 : index
    %c0_0 = arith.constant 0 : index
    %0 = vector.load %arg1[%c0, %c0_0] : memref<8x8xf32, #tpu.memory_space<vmem>>, vector<8x8xf32>
    %c0_1 = arith.constant 0 : index
    %c0_2 = arith.constant 0 : index
    %1 = vector.load %arg2[%c0_1, %c0_2] : memref<8x32xf32, #tpu.memory_space<vmem>>, vector<8x32xf32>
    %cst = arith.constant dense<0.000000e+00> : vector<8x32xf32>
    %2 = tpu.matmul %0, %1, %cst {dimension_numbers = #tpu.dot_dimension_numbers<[1], [0], [0], [1], [0, 0, 1, 1], [], []>} : vector<8x8xf32>, vector<8x32xf32>, vector<8x32xf32> -> vector<8x32xf32>
    %c0_3 = arith.constant 0 : index
    %c0_4 = arith.constant 0 : index
    %3 = vector.load %arg3[%c0_3, %c0_4] : memref<1x32xf32, #tpu.memory_space<vmem>>, vector<1x32xf32>
    %4 = vector.broadcast %3 : vector<1x32xf32> to vector<8x32xf32>
    %5 = arith.addf %2, %4 : vector<8x32xf32>
    %cst_5 = arith.constant 0.000000e+00 : f32
    %6 = vector.broadcast %cst_5 : f32 to vector<8x32xf32>
    %7 = arith.maximumf %5, %6 : vector<8x32xf32>
    %c0_6 = arith.constant 0 : index
    %c0_7 = arith.constant 0 : index
    %8 = vector.load %arg4[%c0_6, %c0_7] : memref<32x8xf32, #tpu.memory_space<vmem>>, vector<32x8xf32>
    %cst_8 = arith.constant dense<0.000000e+00> : vector<8x8xf32>
    %9 = tpu.matmul %7, %8, %cst_8 {dimension_numbers = #tpu.dot_dimension_numbers<[1], [0], [0], [1], [0, 0, 1, 1], [], []>} : vector<8x32xf32>, vector<32x8xf32>, vector<8x8xf32> -> vector<8x8xf32>
    %c0_9 = arith.constant 0 : index
    %c0_10 = arith.constant 0 : index
    %10 = vector.load %arg5[%c0_9, %c0_10] : memref<1x8xf32, #tpu.memory_space<vmem>>, vector<1x8xf32>
    %11 = vector.broadcast %10 : vector<1x8xf32> to vector<8x8xf32>
    %12 = arith.addf %9, %11 : vector<8x8xf32>
    %c0_11 = arith.constant 0 : index
    %c0_12 = arith.constant 0 : index
    %13 = vector.load %arg6[%c0_11, %c0_12] : memref<8x8xf32, #tpu.memory_space<vmem>>, vector<8x8xf32>
    tpu.vector_store %arg6[%c0_11, %c0_12], %12 {strides = array<i32>} : memref<8x8xf32, #tpu.memory_space<vmem>>, vector<8x8xf32>,
    return
  }
  func.func @transform_0(%arg0: i32) -> (i32, i32) {
    %c0_i32 = arith.constant 0 : i32
    %c0_i32_0 = arith.constant 0 : i32
    return %arg0, %c0_i32 : i32, i32
  }
  func.func @transform_1(%arg0: i32) -> (i32, i32) {
    %c0_i32 = arith.constant 0 : i32
    %c0_i32_0 = arith.constant 0 : i32
    %c0_i32_1 = arith.constant 0 : i32
    return %c0_i32, %c0_i32_0 : i32, i32
  }
  func.func @transform_2(%arg0: i32) -> (i32, i32) {
    %c0_i32 = arith.constant 0 : i32
    %c0_i32_0 = arith.constant 0 : i32
    %c0_i32_1 = arith.constant 0 : i32
    return %c0_i32, %c0_i32_0 : i32, i32
  }
  func.func @transform_3(%arg0: i32) -> (i32, i32) {
    %c0_i32 = arith.constant 0 : i32
    %c0_i32_0 = arith.constant 0 : i32
    %c0_i32_1 = arith.constant 0 : i32
    return %c0_i32, %c0_i32_0 : i32, i32
  }
  func.func @transform_4(%arg0: i32) -> (i32, i32) {
    %c0_i32 = arith.constant 0 : i32
    %c0_i32_0 = arith.constant 0 : i32
    %c0_i32_1 = arith.constant 0 : i32
    return %c0_i32, %c0_i32_0 : i32, i32
  }
  func.func @transform_5(%arg0: i32) -> (i32, i32) {
    %c0_i32 = arith.constant 0 : i32
    %c0_i32_0 = arith.constant 0 : i32
    return %arg0, %c0_i32 : i32, i32
  }
}

</mosaic_0001>

<bundles_post_ra>
// kernel: tpu_custom_call.1
= control target key start
LH: loop header
LB: loop body
LE: loop exit
PB: predicated region body
PF: predicated region fallthrough
CT: control target
= control target key end

     0   :  { %vm27_vm0 = vcmask 64512   ;;  %s192_s0 = inlined_call_operand.vmem [shape: f32[8,8], index: 0, kind: input, shape index: {}]   ;;  %s193_s1 = inlined_call_operand.vmem [shape: f32[8,32], index: 1, kind: input, shape index: {}]   ;;  %s194_s2 = inlined_call_operand.vmem [shape: f32[1,32], index: 2, kind: input, shape index: {}]   ;;  %s195_s3 = inlined_call_operand.vmem [shape: f32[32,8], index: 3, kind: input, shape index: {}]   ;;  %s196_s4 = inlined_call_operand.vmem [shape: f32[1,8], index: 4, kind: input, shape index: {}]   ;;  %s197_s5 = inlined_call_operand.hbm [shape: f32[8,8], index: 5, kind: output, shape index: {}]  }
   0x1   :  { %v22_v0 = vld [vmem:[%s193_s1] sm:$0xff]  ;;  %v55_v2 = vld [vmem:[%s195_s3 + $0x18] sm:$0xff] }
   0x2   :  { %v21_v1 = vld [vmem:[%s192_s0] sm:$0xff]  ;;  %46 = vmatpush.msra.mxu0 %v22_v0  ;;  %76 = vmatpush.msra.mxu1 %v55_v2 }
   0x3   :  { %101 = vmatmul.msk.f32.vlgmr.msra.gmra.mxu0 %vm27_vm0, %v21_v1 }
   0x4   :  { %10 = vsyncpa [#allocation3], 0  ;;  %v54_v3 = vld [vmem:[%s195_s3 + $0x10] sm:$0xff]  ;;  %v53_v4 = vld [vmem:[%s195_s3 + $0x8] sm:$0xff]  ;;  %vm60_vm1 = vcmask 261120   ;;  %s132_s7 = smov [#allocation2]  }
   0x5   :  { %77 = vmatpush.msra.mxu1 %v54_v3  ;;  %v52_v5 = vld [vmem:[%s195_s3] sm:$0xff]  ;;  %s90_s8 = sshll.u32 %s132_s7, 4  ;;  %s92_s3 = sshll.u32 %s197_s5, 4  ;;  %s91_s8 = int_to_ptr.vmem [resolvable:$true] %s90_s8  ;;  %s93_s3 = int_to_ptr.hbm [resolvable:$true] %s92_s3 }
   0x6   :  { %v104_v6 = vld [vmem:[%s194_s2] ss:$0 sm:$0xff] }
   0x7   :  { %78 = vmatpush.msra.mxu1 %v53_v4  ;;  %v105_v10 = vld [vmem:[%s196_s4] ss:$0 sm:$0xff] }
   0x9   :  { %79 = vmatpush.msra.mxu1 %v52_v5 }
  0x80   :  { %v48_v7 = vpop.f32.mrf.mxu0 }
  0x81   :  { %v49_v8 = vadd.f32 %v104_v6, %v48_v7 }
  0x83   :  { %v51_v9 = vmax.f32 %v49_v8, 0.0 }
  0x85   :  { %102 = vmatmul.msk.f32.vlgmr.msra.gmra.mxu1 %vm60_vm1, %v51_v9 }
 0x102   :  { %v81_v11 = vpop.f32.mrf.mxu1 }
 0x103   :  { %v82_v12 = vadd.f32 %v105_v10, %v81_v11 }
 0x105   :  { %84 = vst.msk [vmem:[#allocation2] sm:$0xff] %vm27_vm0, %v82_v12 }
 0x106   :  { %95 = dma.vmem_to_hbm [thread:$0]  %s91_s8, 128, %s93_s3, [#allocation3]  }
 0x107   :  { %130 = dma.done.wait [#allocation3], 128  }
 0x108   :  { %131 = vsyncadd [#allocation3], 4294967168 }
 0x109   :  { %100 = vsyncpa [#allocation3], 1 }

</bundles_post_ra>
